<compile_context>
chip_gen: v7x
topology: tpu7x:2x2x1
jax: 0.10.0
libtpu: 0.0.40
codegen_flags: <defaults>
</compile_context>

<pallas_src>
import jax
import jax.numpy as jnp
from jax.experimental import pallas as pl
from jax.experimental.pallas import tpu as pltpu

LANE = 128


def _elementwise_kernel(x_ref, add_ref, sub_ref, mul_ref, div_ref):
    x = x_ref[...]
    add_ref[...] = x + 2                               # torch.add(x, 2)
    sub_ref[...] = x - 1                               # torch.sub(x, 1)
    mul_ref[...] = x * 3                               # torch.mul(x, 3)
    div_ref[...] = x.astype(div_ref.dtype) * 0.5       # torch.div(x, 2) (true division)


def _detect_budget():
    """Returns (step_budget_bytes, min_grid_steps).

    step_budget = total bytes of ONE grid step across all 5 streams (the
    double-buffered footprint is 2x this).  min_grid_steps keeps enough steps
    for pipelining (and 2 steps per TensorCore on v7x's two cores)."""
    kind = ""
    try:
        kind = jax.devices()[0].device_kind.lower()
    except Exception:
        pass
    if "v7" in kind:
        # 64 MiB physical VMEM: ~3.6 MiB per f32 stream, ~47 MiB limit after 2x + headroom
        return 18 << 20, 4
    if "v6" in kind:
        # 128 MiB physical: a bit larger than the conservative default
        return 12 << 20, 2
    # v5e / v5p / unknown: conservative but still well past the 16 MiB scoped default
    return 10 << 20, 2


def pt_module_forward(x):
    """Returns (x+2, x-1, x*3, x/2), matching PtModule.forward."""
    orig_shape = x.shape
    orig_dtype = x.dtype
    n_elem = int(x.size)
    in_itemsize = jnp.dtype(orig_dtype).itemsize

    # torch.div on integer tensors returns floating point
    div_dtype = orig_dtype if jnp.issubdtype(orig_dtype, jnp.floating) else jnp.float32
    div_itemsize = jnp.dtype(div_dtype).itemsize

    # dtype-aware sublane granularity: (8,128) f32, (16,128) bf16, (32,128) int8/fp8
    sublane = max(8, 32 // in_itemsize)
    granule = sublane * LANE

    x_flat = jnp.ravel(x)

    # Granule-aligned bulk goes through Pallas; the <granule tail (if any) is
    # handled with plain jnp ops.  This avoids a whole-array pad (extra input
    # read+write) and per-output slice copies for ragged sizes.
    bulk = (n_elem // granule) * granule
    tail = n_elem - bulk

    bulk_outs = None
    if bulk > 0:
        rows = bulk // LANE
        x2d = (x_flat if tail == 0 else x_flat[:bulk]).reshape(rows, LANE)

        # Size the block from ALL five streams (input + 3 same-dtype outputs +
        # possibly-wider div output), so integer inputs don't blow the budget.
        bytes_per_row = LANE * (4 * in_itemsize + div_itemsize)
        step_budget, min_steps = _detect_budget()

        block_rows = step_budget // bytes_per_row
        block_rows = max(sublane, (block_rows // sublane) * sublane)
        # keep >= min_steps grid steps when rows allow (pipeline overlap; on
        # v7x this gives each TensorCore at least 2 steps of its own).
        if rows >= min_steps * sublane:
            cap = max(sublane, (rows // min_steps // sublane) * sublane)
            block_rows = min(block_rows, cap)
        block_rows = min(block_rows, rows)
        grid = (pl.cdiv(rows, block_rows),)

        # Explicit VMEM limit: double-buffered step footprint + ~25% headroom.
        step_bytes = block_rows * bytes_per_row
        vmem_limit = int(2 * step_bytes * 1.25) + (2 << 20)

        spec = pl.BlockSpec((block_rows, LANE), lambda i: (i, 0))
        main_sds = jax.ShapeDtypeStruct((rows, LANE), orig_dtype)
        div_sds = jax.ShapeDtypeStruct((rows, LANE), div_dtype)

        cost = pl.CostEstimate(
            flops=4 * bulk,
            transcendentals=0,
            bytes_accessed=bulk * (4 * in_itemsize + div_itemsize),
        )

        outs = pl.pallas_call(
            _elementwise_kernel,
            out_shape=(main_sds, main_sds, main_sds, div_sds),
            grid_spec=pltpu.PrefetchScalarGridSpec(
                num_scalar_prefetch=0,
                grid=grid,
                in_specs=[spec],
                out_specs=[spec, spec, spec, spec],
            ),
            compiler_params=pltpu.CompilerParams(
                dimension_semantics=("parallel",),
                vmem_limit_bytes=vmem_limit,
            ),
            cost_estimate=cost,
        )(x2d)
        bulk_outs = tuple(o.reshape(-1) for o in outs)

    tail_outs = None
    if tail > 0 or bulk == 0:
        t = x_flat[bulk:]
        tail_outs = (t + 2, t - 1, t * 3, t.astype(div_dtype) * 0.5)

    def combine(i):
        if bulk_outs is None:
            y = tail_outs[i]
        elif tail_outs is None:
            y = bulk_outs[i]
        else:
            y = jnp.concatenate([bulk_outs[i], tail_outs[i]])
        return y.reshape(orig_shape)

    return tuple(combine(i) for i in range(4))


if __name__ == "__main__":
    key = jax.random.PRNGKey(0)
    x = jax.random.normal(key, (2, 4, 16, 16), dtype=jnp.float32)

    x1, x2, x3, x4 = pt_module_forward(x)
    jax.block_until_ready((x1, x2, x3, x4))

    # correctness check against plain JAX reference
    assert jnp.allclose(x1, x + 2.0)
    assert jnp.allclose(x2, x - 1.0)
    assert jnp.allclose(x3, x * 3.0)
    assert jnp.allclose(x4, x / 2.0)

    # ragged-size check: exercises the granule-aligned bulk + jnp tail split
    xr = jax.random.normal(jax.random.PRNGKey(0), (9, 131), dtype=jnp.float32)
    r1, r2, r3, r4 = pt_module_forward(xr)
    jax.block_until_ready((r1, r2, r3, r4))
    assert jnp.allclose(r1, xr + 2.0)
    assert jnp.allclose(r2, xr - 1.0)
    assert jnp.allclose(r3, xr * 3.0)
    assert jnp.allclose(r4, xr / 2.0)

    print("KERNEL_OK")
</pallas_src>

<mosaic_0001>
module attributes {stable_mosaic.version = 11 : i64} {
  func.func @_elementwise_kernel(%arg0: i32, %arg1: memref<8x128xf32, #tpu.memory_space<vmem>>, %arg2: memref<8x128xf32, #tpu.memory_space<vmem>>, %arg3: memref<8x128xf32, #tpu.memory_space<vmem>>, %arg4: memref<8x128xf32, #tpu.memory_space<vmem>>, %arg5: memref<8x128xf32, #tpu.memory_space<vmem>>) attributes {dimension_semantics = [#tpu.dimension_semantics<parallel>], iteration_bounds = array<i64: 2>, scalar_prefetch = 0 : i64, scratch_operands = 0 : i64, tpu.core_type = #tpu.core_type<tc>, window_params = [{transform_indices = @transform_0, window_bounds = array<i64: 8, 128>}, {transform_indices = @transform_1, window_bounds = array<i64: 8, 128>}, {transform_indices = @transform_2, window_bounds = array<i64: 8, 128>}, {transform_indices = @transform_3, window_bounds = array<i64: 8, 128>}, {transform_indices = @transform_4, window_bounds = array<i64: 8, 128>}]} {
    %c0 = arith.constant 0 : index
    %c0_0 = arith.constant 0 : index
    %0 = vector.load %arg1[%c0, %c0_0] : memref<8x128xf32, #tpu.memory_space<vmem>>, vector<8x128xf32>
    %cst = arith.constant 2.000000e+00 : f32
    %1 = vector.broadcast %cst : f32 to vector<8x128xf32>
    %2 = arith.addf %0, %1 : vector<8x128xf32>
    %c0_1 = arith.constant 0 : index
    %c0_2 = arith.constant 0 : index
    %3 = vector.load %arg2[%c0_1, %c0_2] : memref<8x128xf32, #tpu.memory_space<vmem>>, vector<8x128xf32>
    tpu.vector_store %arg2[%c0_1, %c0_2], %2 {strides = array<i32>} : memref<8x128xf32, #tpu.memory_space<vmem>>, vector<8x128xf32>,
    %cst_3 = arith.constant 1.000000e+00 : f32
    %4 = vector.broadcast %cst_3 : f32 to vector<8x128xf32>
    %5 = arith.subf %0, %4 : vector<8x128xf32>
    %c0_4 = arith.constant 0 : index
    %c0_5 = arith.constant 0 : index
    %6 = vector.load %arg3[%c0_4, %c0_5] : memref<8x128xf32, #tpu.memory_space<vmem>>, vector<8x128xf32>
    tpu.vector_store %arg3[%c0_4, %c0_5], %5 {strides = array<i32>} : memref<8x128xf32, #tpu.memory_space<vmem>>, vector<8x128xf32>,
    %cst_6 = arith.constant 3.000000e+00 : f32
    %7 = vector.broadcast %cst_6 : f32 to vector<8x128xf32>
    %8 = arith.mulf %0, %7 : vector<8x128xf32>
    %c0_7 = arith.constant 0 : index
    %c0_8 = arith.constant 0 : index
    %9 = vector.load %arg4[%c0_7, %c0_8] : memref<8x128xf32, #tpu.memory_space<vmem>>, vector<8x128xf32>
    tpu.vector_store %arg4[%c0_7, %c0_8], %8 {strides = array<i32>} : memref<8x128xf32, #tpu.memory_space<vmem>>, vector<8x128xf32>,
    %cst_9 = arith.constant 5.000000e-01 : f32
    %10 = vector.broadcast %cst_9 : f32 to vector<8x128xf32>
    %11 = arith.mulf %0, %10 : vector<8x128xf32>
    %c0_10 = arith.constant 0 : index
    %c0_11 = arith.constant 0 : index
    %12 = vector.load %arg5[%c0_10, %c0_11] : memref<8x128xf32, #tpu.memory_space<vmem>>, vector<8x128xf32>
    tpu.vector_store %arg5[%c0_10, %c0_11], %11 {strides = array<i32>} : memref<8x128xf32, #tpu.memory_space<vmem>>, vector<8x128xf32>,
    return
  }
  func.func @transform_0(%arg0: i32) -> (i32, i32) {
    %c0_i32 = arith.constant 0 : i32
    %c0_i32_0 = arith.constant 0 : i32
    return %arg0, %c0_i32 : i32, i32
  }
  func.func @transform_1(%arg0: i32) -> (i32, i32) {
    %c0_i32 = arith.constant 0 : i32
    %c0_i32_0 = arith.constant 0 : i32
    return %arg0, %c0_i32 : i32, i32
  }
  func.func @transform_2(%arg0: i32) -> (i32, i32) {
    %c0_i32 = arith.constant 0 : i32
    %c0_i32_0 = arith.constant 0 : i32
    return %arg0, %c0_i32 : i32, i32
  }
  func.func @transform_3(%arg0: i32) -> (i32, i32) {
    %c0_i32 = arith.constant 0 : i32
    %c0_i32_0 = arith.constant 0 : i32
    return %arg0, %c0_i32 : i32, i32
  }
  func.func @transform_4(%arg0: i32) -> (i32, i32) {
    %c0_i32 = arith.constant 0 : i32
    %c0_i32_0 = arith.constant 0 : i32
    return %arg0, %c0_i32 : i32, i32
  }
}

</mosaic_0001>

<bundles_post_ra>
// kernel: tpu_custom_call.1
= control target key start
LH: loop header
LB: loop body
LE: loop exit
PB: predicated region body
PF: predicated region fallthrough
CT: control target
= control target key end

     0   :  { %s1046_s0 = inlined_call_operand.hbm [shape: f32[16,128], index: 0, kind: input, shape index: {}]   ;;  %s1047_s1 = inlined_call_operand.hbm [shape: f32[16,128], index: 1, kind: output, shape index: {0}]   ;;  %s1048_s2 = inlined_call_operand.hbm [shape: f32[16,128], index: 2, kind: output, shape index: {1}]   ;;  %s1049_s3 = inlined_call_operand.hbm [shape: f32[16,128], index: 3, kind: output, shape index: {2}]   ;;  %s1050_s4 = inlined_call_operand.hbm [shape: f32[16,128], index: 4, kind: output, shape index: {3}]  }
   0x1   :  { %1055 = sst [smem:[#allocation18_spill]] %s1046_s0 }
   0x2   :  { %10 = vsyncpa [#allocation3], 0 }
   0x3   :  { %12 = vsyncpa [#allocation3 + $0x1], 0 }
   0x4   :  { %13 = vsyncpa [#allocation4], 0 }
   0x5   :  { %15 = vsyncpa [#allocation4 + $0x1], 0 }
   0x6   :  { %16 = vsyncpa [#allocation7], 0 }
   0x7   :  { %18 = vsyncpa [#allocation7 + $0x1], 0 }
   0x8   :  { %19 = vsyncpa [#allocation10], 0 }
   0x9   :  { %21 = vsyncpa [#allocation10 + $0x1], 0  ;;  %s784_s15 = smov 0   ;;  %s786_s16 = smov 0  }
   0xa   :  { %s788_s17 = smov 0   ;;  %s790_s18 = smov 0  }
   0xb LB: > { %1056 = sst [smem:[#allocation15_spill]] %s744_s16  ;;  %s805_s19 = sadd.s32 4294967295, %s752_s18   ;;  %s752_s18 = sphi %s790_s18, %s1074_s18   ;;  %s748_s17 = sphi %s788_s17, %s1073_s17   ;;  %s744_s16 = sphi %s786_s16, %s1072_s16   ;;  %s740_s15 = sphi %s784_s15, %s1071_s15  }
   0xc   : > { %1057 = sst [smem:[#allocation16_spill]] %s748_s17  ;;  %s1052_s20 = sadd.s32 4294967294, %s752_s18  }
   0xd   : > { %s809_s21 = sadd.s32 1, %s752_s18   ;;  %s34_s22 = sadd.s32 1, %s748_s17 }
   0xe   : > { %s31_s23 = ssub.s32 %s752_s18, %s809_s21  ;;  %p41_p0 = scmp.ne.s32.totalorder %s748_s17, %s744_s16 }
   0xf   : > { %p32_p1 = scmp.eq.s32.totalorder %s31_s23, 0  ;;  %p42_p2 = scmp.eq.s32.totalorder %s752_s18, 0 }
  0x10   : > { %p47_p3 = scmp.ne.s32.totalorder %s744_s16, %s740_s15  ;;  %p48_p4 = scmp.eq.s32.totalorder %s805_s19, 0 }
  0x11   : > { %s821_s24 = scalar_select %p32_p1, %s748_s17, %s34_s22  }
  0x12   : > { %p823_p5 = por %p42_p2, %p41_p0  ;;  %p827_p6 = por %p48_p4, %p47_p3 }
  0x13   : > { %1058 = sst [smem:[#allocation17_spill]] %s821_s24  ;;  %p71_p7 = scmp.eq.s32.totalorder %s805_s19, 1 }
  0x14   : > { %p77_p8 = scmp.eq.s32.totalorder %s1052_s20, 1  ;;  %p530_p10 = scmp.lt.s32.totalorder %s752_s18, 2 }
  0x15   : > { %p836_p11 = por %p71_p7, %p41_p0  ;;  %s175_s29 = sand.u32 1, %s748_s17  }
  0x16   : > { %p840_p12 = por %p77_p8, %p47_p3  ;;  %s485_s30 = sshll.u32 %s752_s18, 7 }
  0x17   : > { %s1061_s27 = scalar_select %p836_p11, 1, 0 }
  0x18   : > { %s1062_s28 = scalar_select %p840_p12, 1, 0 }
  0x19   : > { %s484_s5 = sshll.u32 %s175_s29, 3  ;;  %s1063_s0 = sld [smem:[#allocation18_spill]] }
  0x1a   : > { %s179_s9 = scalar_lea.vmem [#allocation2], %s484_s5  ;;  %p853_p13 = pnand %p530_p10, %p823_p5 }
  0x1b   : > { %s186_s10 = sshll.u32 %s179_s9, 4  ;;  %s176_s12 = scalar_lea.sflag [#allocation3], %s175_s29  ;;  %s857_s10 = int_to_ptr.vmem [resolvable:$true] %s186_s10 }
  0x1c   : > { %p566_p3 = pneg %p853_p13 }
  0x1f   : > { %s849_s8 = scalar_lea.hbm %s1063_s0, %s485_s30  ;;  %s569_s23 = scalar_lea.hbm %s1063_s0, 256 }
  0x20   : > { %s564_s13 = scalar_lea.hbm %s849_s8, 128  ;;  %p570_p5 = scmp.lt.u32.totalorder %s849_s8, %s1063_s0 }
  0x21   : > { %p565_p2 = scmp.ne.s32.totalorder %s849_s8, %s564_s13  ;;  %p571_p8 = scmp.lt.u32.totalorder %s569_s23, %s564_s13 }
  0x22   : > { %p573_p9 = scmp.lt.u32.totalorder %s564_s13, %s849_s8 }
  0x23   : > { %p567_p4 = pnand %p566_p3, %p565_p2  ;;  %p572_p10 = por %p571_p8, %p570_p5 }
  0x25   : > { %p568_p7 = pneg %p567_p4  ;;  %p574_p0 = por %p573_p9, %p572_p10 }
  0x27   : > { %p575_p1 = pnand %p574_p0, %p568_p7 }
  0x29   : > { %578 = shalt.err (!%p575_p1)
}
  0x2a   : > { %s579_s29 = scalar_lea.vmem %s857_s10, 128  ;;  %s754_s5 = smov [#allocation2]  }
  0x2b   : > { %p580_p2 = scmp.ne.s32.totalorder %s857_s10, %s579_s29  ;;  %s584_s6 = sshll.u32 %s754_s5, 4  ;;  %s585_s6 = int_to_ptr.vmem [resolvable:$false] %s584_s6 }
  0x2c   : > { %s586_s7 = scalar_lea.vmem %s585_s6, 256  ;;  %p587_p11 = scmp.lt.s32.totalorder %s857_s10, %s585_s6 }
  0x2d   : > { %p582_p4 = pnand %p580_p2, %p566_p3  ;;  %p588_p5 = scmp.lt.s32.totalorder %s586_s7, %s579_s29 }
  0x2f   : > { %p583_p12 = pneg %p582_p4  ;;  %p589_p8 = por %p588_p5, %p587_p11 }
  0x31   : > { %p590_p9 = pnand %p589_p8, %p583_p12 }
  0x33   : > { %593 = shalt.err (!%p590_p9)
}
  0x34   : > { %516 = dma.hbm_to_vmem [thread:$0]  (!%p853_p13), %s849_s8, 128, %s857_s10, %s176_s12  }
  0x35   : > { %p1065_p0 = scmp.lt.s32.totalorder %s752_s18, 3  ;;  %p1066_p1 = scmp.ge.s32.totalorder %s752_s18, 1 }
  0x37   : > { %p192_p3 = pnand %p1066_p1, %p1065_p0 }
  0x38   : > { %s891_s9 = sand.u32 (!%p192_p3), 1, %s744_s16  }
  0x39   : > { %195 = sbr.rel (%p192_p3) target bundleno = 164 (0xa4), region = 24  ;;  %s894_s13 = sshll.u32 (!%p192_p3), %s891_s9, 3 }
  0x3a   : > { %s198_s14 = scalar_lea.sflag (!%p192_p3), [#allocation3], %s891_s9  ;;  %s201_s11 = scalar_lea.vmem (!%p192_p3), [#allocation2], %s894_s13 }
  0x40   : > { %723 = dma.done.wait (%p827_p6), %s198_s14, 128  }
  0x41   : > { %725 = vsyncadd (%p827_p6), %s198_s14, 4294967168  ;;  %s226_s8 = scalar_lea.vmem [#allocation6], %s894_s13  ;;  %s219_s12 = scalar_lea.vmem [#allocation5], %s894_s13  ;;  %v241_v0 = vld [vmem:[%s201_s11] sm:$0xff] }
  0x42   : > { %s292_s10 = sshll.u32 %s226_s8, 4  ;;  %s279_s22 = sshll.u32 %s219_s12, 4  ;;  %v492_v1 = vadd.f32 -1.0, %v241_v0  ;;  %v242_v2 = vadd.f32 2.0, %v241_v0  ;;  %v246_v3 = vmul.f32 3.0, %v241_v0  ;;  %v248_v4 = vmul.f32 0.5, %v241_v0  ;;  %s903_s10 = int_to_ptr.vmem [resolvable:$true] %s292_s10  ;;  %s908_s22 = int_to_ptr.vmem [resolvable:$true] %s279_s22 }
  0x43   : > { %s233_s23 = scalar_lea.vmem [#allocation8], %s894_s13  ;;  %s240_s30 = scalar_lea.vmem [#allocation9], %s894_s13 }
  0x44   : > { %s305_s25 = sshll.u32 %s233_s23, 4  ;;  %s318_s29 = sshll.u32 %s240_s30, 4  ;;  %245 = vst [vmem:[%s226_s8] sm:$0xff] %v492_v1  ;;  %243 = vst [vmem:[%s219_s12] sm:$0xff] %v242_v2  ;;  %s910_s25 = int_to_ptr.vmem [resolvable:$true] %s305_s25  ;;  %s914_s29 = int_to_ptr.vmem [resolvable:$true] %s318_s29 }
  0x45   : > { %s255_s26 = sand.u32 1, %s805_s19   ;;  %s497_s5 = sshll.u32 %s805_s19, 7  ;;  %247 = vst [vmem:[%s233_s23] sm:$0xff] %v246_v3  ;;  %249 = vst [vmem:[%s240_s30] sm:$0xff] %v248_v4 }
  0x46   : > { %s919_s13 = scalar_lea.hbm %s1048_s2, %s497_s5  ;;  %s924_s0 = scalar_lea.hbm %s1047_s1, %s497_s5 }
  0x47   : > { %s929_s24 = scalar_lea.hbm %s1049_s3, %s497_s5  ;;  %s934_s6 = scalar_lea.hbm %s1050_s4, %s497_s5 }
  0x48   : > { %s936_s7 = scalar_lea.sflag [#allocation7], %s255_s26  ;;  %s594_s20 = scalar_lea.vmem %s903_s10, 128 }
  0x49   : > { %p595_p6 = scmp.ne.s32.totalorder %s903_s10, %s594_s20  ;;  %p1067_p11 = scmp.ne.s32.totalorder %s1061_s27, 0 }
  0x4a   : > { %s755_s14 = smov [#allocation6]  }
  0x4b   : > { %p596_p12 = pnand %p595_p6, %p1067_p11  ;;  %s598_s19 = sshll.u32 %s755_s14, 4  ;;  %s599_s19 = int_to_ptr.vmem [resolvable:$false] %s598_s19 }
  0x4c   : > { %s600_s11 = scalar_lea.vmem %s599_s19, 256  ;;  %p601_p7 = scmp.lt.s32.totalorder %s903_s10, %s599_s19 }
  0x4d   : > { %p597_p13 = pneg %p596_p12  ;;  %p602_p10 = scmp.lt.s32.totalorder %s600_s11, %s594_s20 }
  0x4f   : > { %p603_p2 = por %p602_p10, %p601_p7 }
  0x51   : > { %p604_p4 = pnand %p603_p2, %p597_p13 }
  0x53   : > { %607 = shalt.err (!%p604_p4)
}
  0x54   : > { %s608_s16 = scalar_lea.hbm %s919_s13, 128  ;;  %s612_s12 = scalar_lea.hbm %s1048_s2, 256 }
  0x55   : > { %p609_p5 = scmp.ne.s32.totalorder %s919_s13, %s608_s16  ;;  %p613_p0 = scmp.lt.u32.totalorder %s919_s13, %s1048_s2 }
  0x56   : > { %p614_p1 = scmp.lt.u32.totalorder %s612_s12, %s608_s16  ;;  %p616_p6 = scmp.lt.u32.totalorder %s608_s16, %s919_s13 }
  0x57   : > { %p610_p8 = pnand %p609_p5, %p1067_p11 }
  0x58   : > { %p615_p3 = por %p614_p1, %p613_p0 }
  0x59   : > { %p611_p9 = pneg %p610_p8 }
  0x5a   : > { %p617_p12 = por %p616_p6, %p615_p3 }
  0x5c   : > { %p618_p13 = pnand %p617_p12, %p611_p9 }
  0x5e   : > { %621 = shalt.err (!%p618_p13)
}
  0x5f   : > { %506 = dma.vmem_to_hbm [thread:$0]  (%p1067_p11), %s903_s10, 128, %s919_s13, %s936_s7  }
  0x60   : > { %s251_s26 = scalar_lea.sflag [#allocation4], %s891_s9  ;;  %s622_s5 = scalar_lea.vmem %s908_s22, 128 }
  0x61   : > { %p623_p7 = scmp.ne.s32.totalorder %s908_s22, %s622_s5  ;;  %s756_s20 = smov [#allocation5]  }
  0x62   : > { %s626_s14 = sshll.u32 %s756_s20, 4  ;;  %s627_s14 = int_to_ptr.vmem [resolvable:$false] %s626_s14 }
  0x63   : > { %p624_p10 = pnand %p623_p7, %p1067_p11  ;;  %s628_s19 = scalar_lea.vmem %s627_s14, 256 }
  0x64   : > { %p629_p4 = scmp.lt.s32.totalorder %s908_s22, %s627_s14  ;;  %p630_p5 = scmp.lt.s32.totalorder %s628_s19, %s622_s5 }
  0x65   : > { %p625_p2 = pneg %p624_p10 }
  0x66   : > { %p631_p8 = por %p630_p5, %p629_p4 }
  0x68   : > { %p632_p9 = pnand %p631_p8, %p625_p2 }
  0x6a   : > { %635 = shalt.err (!%p632_p9)
}
  0x6b   : > { %s636_s10 = scalar_lea.hbm %s924_s0, 128  ;;  %s640_s16 = scalar_lea.hbm %s1047_s1, 256 }
  0x6c   : > { %p637_p0 = scmp.ne.s32.totalorder %s924_s0, %s636_s10  ;;  %p641_p6 = scmp.lt.u32.totalorder %s924_s0, %s1047_s1 }
  0x6d   : > { %p642_p12 = scmp.lt.u32.totalorder %s640_s16, %s636_s10  ;;  %p644_p7 = scmp.lt.u32.totalorder %s636_s10, %s924_s0 }
  0x6e   : > { %p638_p1 = pnand %p637_p0, %p1067_p11 }
  0x6f   : > { %p643_p13 = por %p642_p12, %p641_p6 }
  0x70   : > { %p639_p3 = pneg %p638_p1 }
  0x71   : > { %p645_p10 = por %p644_p7, %p643_p13 }
  0x73   : > { %p646_p2 = pnand %p645_p10, %p639_p3 }
  0x75   : > { %649 = shalt.err (!%p646_p2)
}
  0x76   : > { %505 = dma.vmem_to_hbm [thread:$0]  (%p1067_p11), %s908_s22, 128, %s924_s0, %s251_s26  }
  0x77   : > { %s650_s12 = scalar_lea.vmem %s910_s25, 128  ;;  %s757_s23 = smov [#allocation8]  }
  0x78   : > { %p651_p4 = scmp.ne.s32.totalorder %s910_s25, %s650_s12  ;;  %s654_s30 = sshll.u32 %s757_s23, 4  ;;  %s655_s30 = int_to_ptr.vmem [resolvable:$false] %s654_s30 }
  0x79   : > { %s656_s5 = scalar_lea.vmem %s655_s30, 256  ;;  %p657_p9 = scmp.lt.s32.totalorder %s910_s25, %s655_s30 }
  0x7a   : > { %p652_p5 = pnand %p651_p4, %p1067_p11  ;;  %p658_p0 = scmp.lt.s32.totalorder %s656_s5, %s650_s12 }
  0x7c   : > { %p653_p8 = pneg %p652_p5  ;;  %p659_p1 = por %p658_p0, %p657_p9 }
  0x7e   : > { %p660_p3 = pnand %p659_p1, %p653_p8 }
  0x80   : > { %663 = shalt.err (!%p660_p3)
}
  0x81   : > { %s664_s0 = scalar_lea.hbm %s929_s24, 128  ;;  %s668_s20 = scalar_lea.hbm %s1049_s3, 256 }
  0x82   : > { %p665_p6 = scmp.ne.s32.totalorder %s929_s24, %s664_s0  ;;  %p669_p7 = scmp.lt.u32.totalorder %s929_s24, %s1049_s3 }
  0x83   : > { %p670_p10 = scmp.lt.u32.totalorder %s668_s20, %s664_s0  ;;  %p672_p4 = scmp.lt.u32.totalorder %s664_s0, %s929_s24 }
  0x84   : > { %p666_p12 = pnand %p665_p6, %p1067_p11 }
  0x85   : > { %p671_p2 = por %p670_p10, %p669_p7 }
  0x86   : > { %p667_p13 = pneg %p666_p12 }
  0x87   : > { %p673_p5 = por %p672_p4, %p671_p2 }
  0x89   : > { %p674_p8 = pnand %p673_p5, %p667_p13 }
  0x8b   : > { %677 = shalt.err (!%p674_p8)
}
  0x8c   : > { %507 = dma.vmem_to_hbm [thread:$0]  (%p1067_p11), %s910_s25, 128, %s929_s24, %s936_s7  }
  0x8d   : > { %s266_s10 = scalar_lea.sflag [#allocation10], %s891_s9  ;;  %s678_s13 = scalar_lea.vmem %s914_s29, 128 }
  0x8e   : > { %p679_p9 = scmp.ne.s32.totalorder %s914_s29, %s678_s13  ;;  %s758_s11 = smov [#allocation9]  }
  0x8f   : > { %s682_s16 = sshll.u32 %s758_s11, 4  ;;  %s683_s16 = int_to_ptr.vmem [resolvable:$false] %s682_s16 }
  0x90   : > { %p680_p0 = pnand %p679_p9, %p1067_p11  ;;  %s684_s17 = scalar_lea.vmem %s683_s16, 256 }
  0x91   : > { %p685_p3 = scmp.lt.s32.totalorder %s914_s29, %s683_s16  ;;  %p686_p6 = scmp.lt.s32.totalorder %s684_s17, %s678_s13 }
  0x92   : > { %p681_p1 = pneg %p680_p0 }
  0x93   : > { %p687_p12 = por %p686_p6, %p685_p3 }
  0x95   : > { %p688_p13 = pnand %p687_p12, %p681_p1 }
  0x97   : > { %691 = shalt.err (!%p688_p13)
}
  0x98   : > { %s692_s24 = scalar_lea.hbm %s934_s6, 128  ;;  %s696_s7 = scalar_lea.hbm %s1050_s4, 256 }
  0x99   : > { %p693_p7 = scmp.ne.s32.totalorder %s934_s6, %s692_s24  ;;  %p697_p4 = scmp.lt.u32.totalorder %s934_s6, %s1050_s4 }
  0x9a   : > { %p698_p5 = scmp.lt.u32.totalorder %s696_s7, %s692_s24  ;;  %p700_p9 = scmp.lt.u32.totalorder %s692_s24, %s934_s6 }
  0x9b   : > { %p694_p10 = pnand %p693_p7, %p1067_p11 }
  0x9c   : > { %p699_p8 = por %p698_p5, %p697_p4 }
  0x9d   : > { %p695_p2 = pneg %p694_p10 }
  0x9e   : > { %p701_p0 = por %p700_p9, %p699_p8 }
  0xa0   : > { %p702_p1 = pnand %p701_p0, %p695_p2 }
  0xa2   : > { %705 = shalt.err (!%p702_p1)
}
  0xa3   : > { %508 = dma.vmem_to_hbm [thread:$0]  (%p1067_p11), %s914_s29, 128, %s934_s6, %s266_s10  }
  0xa4 PF: > { %s330_s23 = sand.u32 1, %s740_s15   ;;  %p1068_p3 = scmp.ne.s32.totalorder %s1062_s28, 0 }
  0xa5   : > { %p1069_p6 = scmp.ge.s32.totalorder %s752_s18, 2  ;;  %s331_s30 = scalar_lea.sflag [#allocation4], %s330_s23 }
  0xa7   : > { %p518_p12 = pnand %p1069_p6, %p1068_p3 }
  0xa9   : > { %727 = dma.done.wait (!%p518_p12), %s331_s30, 128  }
  0xaa   : > { %729 = vsyncadd (!%p518_p12), %s331_s30, 4294967168  ;;  %s1070_s5 = sadd.s32 4294967294, %s752_s18  }
  0xab   : > { %s339_s0 = sand.u32 1, %s1070_s5  }
  0xac   : > { %s340_s22 = scalar_lea.sflag [#allocation7], %s339_s0 }
  0xad   : > { %731 = dma.done.wait (!%p518_p12), %s340_s22, 256  }
  0xae   : > { %733 = vsyncadd (!%p518_p12), %s340_s22, 4294967040  ;;  %s358_s27 = scalar_lea.sflag [#allocation10], %s330_s23 }
  0xaf   : > { %735 = dma.done.wait (!%p518_p12), %s358_s27, 128  }
  0xb0   : > { %737 = vsyncadd (!%p518_p12), %s358_s27, 4294967168  ;;  %s1071_s15 = sld [smem:[#allocation15_spill]]  ;;  %s1072_s16 = sld [smem:[#allocation16_spill]] }
  0xb1   : > { %s1073_s17 = sld [smem:[#allocation17_spill]]  ;;  %p24_p11 = scmp.ge.s32.totalorder %s809_s21, 4  }
  0xb2   : > { %s1074_s18 = smov %s809_s21 }
  0xb3   :  { %26 = sbr.rel (!%p24_p11) target bundleno = 11 (0xb), region = 118 }
  0xba   :  { %363 = vsyncpa [#allocation3], 1 }
  0xbb   :  { %365 = vsyncpa [#allocation3 + $0x1], 1 }
  0xbc   :  { %366 = vsyncpa [#allocation4], 1 }
  0xbd   :  { %368 = vsyncpa [#allocation4 + $0x1], 1 }
  0xbe   :  { %369 = vsyncpa [#allocation7], 1 }
  0xbf   :  { %371 = vsyncpa [#allocation7 + $0x1], 1 }
  0xc0   :  { %372 = vsyncpa [#allocation10], 1 }
  0xc1   :  { %374 = vsyncpa [#allocation10 + $0x1], 1 }

</bundles_post_ra>
